<compile_context>
chip_gen: v7x
topology: tpu7x:2x2x1
jax: 0.10.0
libtpu: 0.0.40
codegen_flags: <defaults>
</compile_context>

<pallas_src>
import functools

import jax
import jax.numpy as jnp
from jax import lax
from jax.experimental import pallas as pl
from jax.experimental.pallas import tpu as pltpu

HID_SIZE = 128
HEAD_N = 128            # lane-padded width of the fused head output (>= 2*act_size + 1)
_MIN_PARALLEL_ROWS = 256  # rows per core needed before splitting across 2 TCs pays off


def acmodel_kernel(x_ref, w_fc_ref, w_heads_ref, b_ref, out_ref, *, act_size):
    # fc: Linear(obs_size, HID_SIZE) + ReLU.  f32 accumulation on the MXU,
    # bias add / ReLU in f32 regardless of the matmul input dtype.
    h = jnp.dot(x_ref[...], w_fc_ref[...], preferred_element_type=jnp.float32)
    h = jnp.maximum(h + b_ref[0:1, :], 0.0)

    # Fused heads: one [HID_SIZE, 128] matmul.
    #   lanes [0, act)        -> mu head (tanh)
    #   lanes [act, 2*act)    -> sigma_sq head (softplus)
    #   lane  2*act           -> state value (identity)
    #   lanes (2*act, 128)    -> zero padding
    z = jnp.dot(h.astype(w_heads_ref.dtype), w_heads_ref[...],
                preferred_element_type=jnp.float32) + b_ref[1:2, :]

    # [1, HEAD_N] lane-index row; jnp.where broadcasts it over the batch tile
    # (no full [tm, 128] int32 iota / compare temporaries).
    lane = lax.broadcasted_iota(jnp.int32, (1, HEAD_N), 1)

    # Incremental blend so only one full-tile temporary is live at a time.
    # numerically stable softplus: max(z,0) + log1p(exp(-|z|))
    out = jnp.where(jnp.logical_and(lane >= act_size, lane < 2 * act_size),
                    jnp.maximum(z, 0.0) + jnp.log1p(jnp.exp(-jnp.abs(z))),
                    z)
    out = jnp.where(lane < act_size, jnp.tanh(z), out)
    out_ref[...] = out.astype(out_ref.dtype)


def pack_params(params, act_size, *, dtype=jnp.float32):
    """Pack the 4 Linear layers into 3 lane-dense slabs for the kernel.

    `dtype` sets the matmul-input dtype (use jnp.bfloat16 on v6e/v7x for the
    bf16-native MXU path). Biases stay f32; accumulation/activations are f32.
    """
    assert 2 * act_size + 1 <= HEAD_N, "act_size too large for fused 128-lane head"
    assert params["w_fc"].shape[1] == HID_SIZE

    w_heads = jnp.zeros((HID_SIZE, HEAD_N), jnp.float32)
    w_heads = w_heads.at[:, 0:act_size].set(params["w_mu"])
    w_heads = w_heads.at[:, act_size:2 * act_size].set(params["w_sg"])
    w_heads = w_heads.at[:, 2 * act_size:2 * act_size + 1].set(params["w_v"])

    b_heads = jnp.zeros((1, HEAD_N), jnp.float32)
    b_heads = b_heads.at[:, 0:act_size].set(params["b_mu"])
    b_heads = b_heads.at[:, act_size:2 * act_size].set(params["b_sg"])
    b_heads = b_heads.at[:, 2 * act_size:2 * act_size + 1].set(params["b_v"])

    # single [2, 128] bias slab: row 0 = fc bias, row 1 = fused head bias (f32)
    b = jnp.concatenate([params["b_fc"], b_heads], axis=0).astype(jnp.float32)
    return params["w_fc"].astype(dtype), w_heads.astype(dtype), b


def _choose_tile(B, tm):
    """Pick (num_tiles, tile_rows). Big tiles amortize per-step overhead; once
    the batch is large enough, guarantee >=2 tiles so both v7x TCs get work."""
    n = pl.cdiv(B, tm)
    if n == 1 and B >= 2 * _MIN_PARALLEL_ROWS:
        n = 2
    if n == 1:
        return 1, B                       # block == full array dims
    tm_eff = pl.cdiv(pl.cdiv(B, n), 8) * 8  # keep sublane (8) alignment
    return n, tm_eff


def acmodel_forward(x, packed, act_size, *, tm=512, min_pallas_batch=256,
                    use_pallas=None, out_dtype=jnp.float32, return_packed=False):
    """x: [B, obs_size]. packed: (w_fc [obs,128], w_heads [128,128], b [2,128])."""
    w_fc, w_heads, b = packed
    B, obs = x.shape
    compute_dtype = w_fc.dtype

    if use_pallas is None:
        use_pallas = B >= min_pallas_batch

    if not use_pallas:
        # Tiny-batch fallback: pallas_call launch cost > XLA-fused MLP here.
        h = jnp.maximum(jnp.dot(x.astype(compute_dtype), w_fc,
                                preferred_element_type=jnp.float32) + b[0:1], 0.0)
        z = jnp.dot(h.astype(compute_dtype), w_heads,
                    preferred_element_type=jnp.float32) + b[1:2]
        lane = jnp.arange(HEAD_N)[None, :]
        out = jnp.where((lane >= act_size) & (lane < 2 * act_size),
                        jax.nn.softplus(z), z)
        out = jnp.where(lane < act_size, jnp.tanh(z), out).astype(out_dtype)
    else:
        n_tiles, tm_eff = _choose_tile(B, tm)
        Bp = n_tiles * tm_eff
        xk = x.astype(compute_dtype)
        if Bp != B:
            xk = jnp.pad(xk, ((0, Bp - B), (0, 0)))

        kernel = functools.partial(acmodel_kernel, act_size=act_size)
        out = pl.pallas_call(
            kernel,
            out_shape=jax.ShapeDtypeStruct((Bp, HEAD_N), out_dtype),
            grid=(n_tiles,),
            in_specs=[
                pl.BlockSpec((tm_eff, obs), lambda i: (i, 0)),          # x batch tile
                pl.BlockSpec((obs, HID_SIZE), lambda i: (0, 0)),        # fc weight (resident)
                pl.BlockSpec((HID_SIZE, HEAD_N), lambda i: (0, 0)),     # fused head weight
                pl.BlockSpec((2, HEAD_N), lambda i: (0, 0)),            # bias slab (f32)
            ],
            out_specs=pl.BlockSpec((tm_eff, HEAD_N), lambda i: (i, 0)),
            compiler_params=pltpu.CompilerParams(
                dimension_semantics=("parallel",)),
        )(xk, w_fc, w_heads, b)
        if Bp != B:
            out = out[:B]

    if return_packed:
        return out
    mu = out[:, 0:act_size]
    sigma_sq = out[:, act_size:2 * act_size]
    state_val = out[:, 2 * act_size:2 * act_size + 1]
    return mu, sigma_sq, state_val


def init_params(key, obs_size, act_size):
    """PyTorch-Linear-style init (uniform(-1/sqrt(fan_in), +)).

    Weights stored [in, out] (transposed vs. torch) so the kernel does x @ W.
    """
    def linear(key, fan_in, fan_out):
        kw, kb = jax.random.split(key)
        bound = 1.0 / jnp.sqrt(fan_in)
        w = jax.random.uniform(kw, (fan_in, fan_out), jnp.float32, -bound, bound)
        bb = jax.random.uniform(kb, (1, fan_out), jnp.float32, -bound, bound)
        return w, bb

    k1, k2, k3, k4 = jax.random.split(key, 4)
    w_fc, b_fc = linear(k1, obs_size, HID_SIZE)
    w_mu, b_mu = linear(k2, HID_SIZE, act_size)
    w_sg, b_sg = linear(k3, HID_SIZE, act_size)
    w_v, b_v = linear(k4, HID_SIZE, 1)
    return dict(w_fc=w_fc, b_fc=b_fc, w_mu=w_mu, b_mu=b_mu,
                w_sg=w_sg, b_sg=b_sg, w_v=w_v, b_v=b_v)


def reference_forward(x, p):
    h = jnp.maximum(x @ p["w_fc"] + p["b_fc"], 0.0)
    mu = jnp.tanh(h @ p["w_mu"] + p["b_mu"])
    sg = jax.nn.softplus(h @ p["w_sg"] + p["b_sg"])
    v = h @ p["w_v"] + p["b_v"]
    return mu, sg, v


if __name__ == "__main__":
    key = jax.random.PRNGKey(0)
    obs_size, act_size = 16, 8

    k_x, k_xb, k_p = jax.random.split(key, 3)
    params = init_params(k_p, obs_size, act_size)
    packed_f32 = pack_params(params, act_size)   # one-time packing, outside the hot path

    # --- small-shape check (forced through the Pallas path) -------------------
    batch = 8
    x = jax.random.normal(k_x, (batch, obs_size), jnp.float32)
    mu, sigma_sq, state_val = acmodel_forward(x, packed_f32, act_size, use_pallas=True)
    jax.block_until_ready((mu, sigma_sq, state_val))

    mu_r, sg_r, v_r = reference_forward(x, params)
    assert mu.shape == (batch, act_size)
    assert sigma_sq.shape == (batch, act_size)
    assert state_val.shape == (batch, 1)
    assert jnp.allclose(mu, mu_r, atol=1e-5)
    assert jnp.allclose(sigma_sq, sg_r, atol=1e-5)
    assert jnp.allclose(state_val, v_r, atol=1e-5)

    # --- tiny-batch pure-JAX fallback path -------------------------------------
    mu_f, sg_f, v_f = acmodel_forward(x, packed_f32, act_size, use_pallas=False)
    assert jnp.allclose(mu_f, mu_r, atol=1e-5)
    assert jnp.allclose(sg_f, sg_r, atol=1e-5)
    assert jnp.allclose(v_f, v_r, atol=1e-5)

    # --- larger batch: exercises the 2-tile (megacore) + padding path, f32 ----
    big = 600
    xb = jax.random.normal(k_xb, (big, obs_size), jnp.float32)
    mu_b, sg_b, v_b = acmodel_forward(xb, packed_f32, act_size)   # auto -> Pallas
    jax.block_until_ready((mu_b, sg_b, v_b))
    mu_rb, sg_rb, v_rb = reference_forward(xb, params)
    assert mu_b.shape == (big, act_size) and v_b.shape == (big, 1)
    assert jnp.allclose(mu_b, mu_rb, atol=1e-5)
    assert jnp.allclose(sg_b, sg_rb, atol=1e-5)
    assert jnp.allclose(v_b, v_rb, atol=1e-5)

    # --- bf16 matmul inputs + bf16 output slab (v6e/v7x fast path) ------------
    packed_bf16 = pack_params(params, act_size, dtype=jnp.bfloat16)
    mu_h, sg_h, v_h = acmodel_forward(xb, packed_bf16, act_size,
                                      out_dtype=jnp.bfloat16)
    jax.block_until_ready((mu_h, sg_h, v_h))
    assert jnp.allclose(mu_h.astype(jnp.float32), mu_rb, atol=3e-2, rtol=3e-2)
    assert jnp.allclose(sg_h.astype(jnp.float32), sg_rb, atol=3e-2, rtol=3e-2)
    assert jnp.allclose(v_h.astype(jnp.float32), v_rb, atol=3e-2, rtol=3e-2)

    print("KERNEL_OK")
</pallas_src>

<mosaic_0001>
module attributes {stable_mosaic.version = 11 : i64} {
  func.func @acmodel_kernel(%arg0: i32, %arg1: memref<8x16xf32, #tpu.memory_space<vmem>>, %arg2: memref<16x128xf32, #tpu.memory_space<vmem>>, %arg3: memref<128x128xf32, #tpu.memory_space<vmem>>, %arg4: memref<2x128xf32, #tpu.memory_space<vmem>>, %arg5: memref<8x128xf32, #tpu.memory_space<vmem>>) attributes {dimension_semantics = [#tpu.dimension_semantics<parallel>], iteration_bounds = array<i64: 1>, scalar_prefetch = 0 : i64, scratch_operands = 0 : i64, tpu.core_type = #tpu.core_type<tc>, window_params = [{transform_indices = @transform_0, window_bounds = array<i64: 8, 16>}, {pipeline_mode = #tpu.pipeline_mode<synchronous>, transform_indices = @transform_1, window_bounds = array<i64: 16, 128>}, {pipeline_mode = #tpu.pipeline_mode<synchronous>, transform_indices = @transform_2, window_bounds = array<i64: 128, 128>}, {pipeline_mode = #tpu.pipeline_mode<synchronous>, transform_indices = @transform_3, window_bounds = array<i64: 2, 128>}, {transform_indices = @transform_4, window_bounds = array<i64: 8, 128>}]} {
    %c0 = arith.constant 0 : index
    %c0_0 = arith.constant 0 : index
    %0 = vector.load %arg1[%c0, %c0_0] : memref<8x16xf32, #tpu.memory_space<vmem>>, vector<8x16xf32>
    %c0_1 = arith.constant 0 : index
    %c0_2 = arith.constant 0 : index
    %1 = vector.load %arg2[%c0_1, %c0_2] : memref<16x128xf32, #tpu.memory_space<vmem>>, vector<16x128xf32>
    %cst = arith.constant dense<0.000000e+00> : vector<8x128xf32>
    %2 = tpu.matmul %0, %1, %cst {dimension_numbers = #tpu.dot_dimension_numbers<[1], [0], [0], [1], [0, 0, 1, 1], [], []>} : vector<8x16xf32>, vector<16x128xf32>, vector<8x128xf32> -> vector<8x128xf32>
    %c0_3 = arith.constant 0 : index
    %c0_4 = arith.constant 0 : index
    %3 = vector.load %arg4[%c0_3, %c0_4] : memref<2x128xf32, #tpu.memory_space<vmem>>, vector<1x128xf32>
    %4 = vector.broadcast %3 : vector<1x128xf32> to vector<8x128xf32>
    %5 = arith.addf %2, %4 : vector<8x128xf32>
    %cst_5 = arith.constant 0.000000e+00 : f32
    %6 = vector.broadcast %cst_5 : f32 to vector<8x128xf32>
    %7 = arith.maximumf %5, %6 : vector<8x128xf32>
    %c0_6 = arith.constant 0 : index
    %c0_7 = arith.constant 0 : index
    %8 = vector.load %arg3[%c0_6, %c0_7] : memref<128x128xf32, #tpu.memory_space<vmem>>, vector<128x128xf32>
    %cst_8 = arith.constant dense<0.000000e+00> : vector<8x128xf32>
    %9 = tpu.matmul %7, %8, %cst_8 {dimension_numbers = #tpu.dot_dimension_numbers<[1], [0], [0], [1], [0, 0, 1, 1], [], []>} : vector<8x128xf32>, vector<128x128xf32>, vector<8x128xf32> -> vector<8x128xf32>
    %c1 = arith.constant 1 : index
    %c0_9 = arith.constant 0 : index
    %10 = vector.load %arg4[%c1, %c0_9] : memref<2x128xf32, #tpu.memory_space<vmem>>, vector<1x128xf32>
    %11 = vector.broadcast %10 : vector<1x128xf32> to vector<8x128xf32>
    %12 = arith.addf %9, %11 : vector<8x128xf32>
    %13 = tpu.iota {dimensions = array<i32: 1>} : vector<1x128xi32>
    %c8_i32 = arith.constant 8 : i32
    %14 = vector.broadcast %c8_i32 : i32 to vector<1x128xi32>
    %15 = arith.cmpi sge, %13, %14 : vector<1x128xi32>
    %c16_i32 = arith.constant 16 : i32
    %16 = vector.broadcast %c16_i32 : i32 to vector<1x128xi32>
    %17 = arith.cmpi slt, %13, %16 : vector<1x128xi32>
    %18 = arith.andi %15, %17 : vector<1x128xi1>
    %cst_10 = arith.constant 0.000000e+00 : f32
    %19 = vector.broadcast %cst_10 : f32 to vector<8x128xf32>
    %20 = arith.maximumf %12, %19 : vector<8x128xf32>
    %21 = math.absf %12 : vector<8x128xf32>
    %cst_11 = arith.constant 0.000000e+00 : f32
    %22 = vector.broadcast %cst_11 : f32 to vector<8x128xf32>
    %23 = arith.subf %22, %21 : vector<8x128xf32>
    %24 = math.exp %23 : vector<8x128xf32>
    %25 = math.log1p %24 : vector<8x128xf32>
    %26 = arith.addf %20, %25 : vector<8x128xf32>
    %27 = vector.shape_cast %18 : vector<1x128xi1> to vector<1x128xi1>
    %28 = vector.broadcast %27 : vector<1x128xi1> to vector<8x128xi1>
    %29 = arith.select %28, %26, %12 : vector<8x128xi1>, vector<8x128xf32>
    %c8_i32_12 = arith.constant 8 : i32
    %30 = vector.broadcast %c8_i32_12 : i32 to vector<1x128xi32>
    %31 = arith.cmpi slt, %13, %30 : vector<1x128xi32>
    %32 = math.tanh %12 : vector<8x128xf32>
    %33 = vector.shape_cast %31 : vector<1x128xi1> to vector<1x128xi1>
    %34 = vector.broadcast %33 : vector<1x128xi1> to vector<8x128xi1>
    %35 = arith.select %34, %32, %29 : vector<8x128xi1>, vector<8x128xf32>
    %c0_13 = arith.constant 0 : index
    %c0_14 = arith.constant 0 : index
    %36 = vector.load %arg5[%c0_13, %c0_14] : memref<8x128xf32, #tpu.memory_space<vmem>>, vector<8x128xf32>
    tpu.vector_store %arg5[%c0_13, %c0_14], %35 {strides = array<i32>} : memref<8x128xf32, #tpu.memory_space<vmem>>, vector<8x128xf32>,
    return
  }
  func.func @transform_0(%arg0: i32) -> (i32, i32) {
    %c0_i32 = arith.constant 0 : i32
    %c0_i32_0 = arith.constant 0 : i32
    return %arg0, %c0_i32 : i32, i32
  }
  func.func @transform_1(%arg0: i32) -> (i32, i32) {
    %c0_i32 = arith.constant 0 : i32
    %c0_i32_0 = arith.constant 0 : i32
    %c0_i32_1 = arith.constant 0 : i32
    return %c0_i32, %c0_i32_0 : i32, i32
  }
  func.func @transform_2(%arg0: i32) -> (i32, i32) {
    %c0_i32 = arith.constant 0 : i32
    %c0_i32_0 = arith.constant 0 : i32
    %c0_i32_1 = arith.constant 0 : i32
    return %c0_i32, %c0_i32_0 : i32, i32
  }
  func.func @transform_3(%arg0: i32) -> (i32, i32) {
    %c0_i32 = arith.constant 0 : i32
    %c0_i32_0 = arith.constant 0 : i32
    %c0_i32_1 = arith.constant 0 : i32
    return %c0_i32, %c0_i32_0 : i32, i32
  }
  func.func @transform_4(%arg0: i32) -> (i32, i32) {
    %c0_i32 = arith.constant 0 : i32
    %c0_i32_0 = arith.constant 0 : i32
    return %arg0, %c0_i32 : i32, i32
  }
}

</mosaic_0001>

<bundles_post_ra>
// kernel: tpu_custom_call.1
= control target key start
LH: loop header
LB: loop body
LE: loop exit
PB: predicated region body
PF: predicated region fallthrough
CT: control target
= control target key end

     0   :  { %9 = vsyncpa [#allocation3], 0  ;;  %s571_s0 = inlined_call_operand.hbm [shape: f32[8,16], index: 0, kind: input, shape index: {}]   ;;  %s572_s1 = inlined_call_operand.hbm [shape: f32[16,128], index: 1, kind: input, shape index: {}]   ;;  %s573_s2 = inlined_call_operand.hbm [shape: f32[128,128], index: 2, kind: input, shape index: {}]   ;;  %s574_s3 = inlined_call_operand.vmem [shape: f32[2,128], index: 3, kind: input, shape index: {}]   ;;  %s575_s4 = inlined_call_operand.hbm [shape: f32[8,128], index: 4, kind: output, shape index: {}]  }
   0x1   :  { %10 = vsyncpa [#allocation6], 0 }
   0x2   :  { %11 = vsyncpa [#allocation4], 0  ;;  %s477_s15 = smov [#allocation5]   ;;  %s383_s19 = scalar_lea.hbm %s572_s1, 256 }
   0x3   :  { %s27_s16 = sshll.u32 %s477_s15, 4  ;;  %p384_p0 = scmp.ne.s32.totalorder %s572_s1, %s383_s19  ;;  %s28_s16 = int_to_ptr.vmem [resolvable:$true] %s27_s16 }
   0x4   :  { %p387_p1 = scmp.lt.u32.totalorder %s383_s19, %s572_s1 }
   0x6   :  { %p389_p2 = pnand %p387_p1, %p384_p0 }
   0x8   :  { %392 = shalt.err (!%p389_p2)
}
   0x9   :  { %s393_s24 = scalar_lea.vmem %s28_s16, 256  ;;  %p398_p4 = scmp.lt.s32.totalorder %s28_s16, %s28_s16 }
   0xa   :  { %p394_p3 = scmp.ne.s32.totalorder %s28_s16, %s393_s24  ;;  %p399_p5 = scmp.lt.s32.totalorder %s393_s24, %s393_s24 }
   0xc   :  { %p400_p6 = por %p399_p5, %p398_p4 }
   0xe   :  { %p401_p7 = pnand %p400_p6, %p394_p3 }
  0x10   :  { %404 = shalt.err (!%p401_p7)
}
  0x11   :  { %s478_s25 = smov 128   ;;  %s479_s26 = smov 8  }
  0x12   :  { %33 = dma.hbm_to_vmem [thread:$0]  %s572_s1, 256, %s28_s16, [#allocation6], %s478_s25, %s478_s25, %s479_s26  }
  0x13   :  { %s480_s29 = smov [#allocation2]   ;;  %s481_s5 = smov [#allocation7]  }
  0x14   :  { %s18_s30 = sshll.u32 %s480_s29, 4  ;;  %s39_s6 = sshll.u32 %s481_s5, 4  ;;  %s19_s30 = int_to_ptr.vmem [resolvable:$true] %s18_s30  ;;  %s40_s6 = int_to_ptr.vmem [resolvable:$true] %s39_s6 }
  0x15   :  { %s405_s9 = scalar_lea.hbm %s571_s0, 128 }
  0x16   :  { %p406_p8 = scmp.ne.s32.totalorder %s571_s0, %s405_s9  ;;  %p409_p9 = scmp.lt.u32.totalorder %s405_s9, %s571_s0 }
  0x18   :  { %p411_p10 = pnand %p409_p9, %p406_p8 }
  0x1a   :  { %414 = shalt.err (!%p411_p10)
}
  0x1b   :  { %s415_s1 = scalar_lea.vmem %s19_s30, 128  ;;  %p420_p12 = scmp.lt.s32.totalorder %s19_s30, %s19_s30 }
  0x1c   :  { %p416_p11 = scmp.ne.s32.totalorder %s19_s30, %s415_s1  ;;  %p421_p13 = scmp.lt.s32.totalorder %s415_s1, %s415_s1 }
  0x1e   :  { %p422_p0 = por %p421_p13, %p420_p12 }
  0x20   :  { %p423_p1 = pnand %p422_p0, %p416_p11 }
  0x22   :  { %426 = shalt.err (!%p423_p1)
}
  0x23   :  { %21 = dma.hbm_to_vmem [thread:$0]  %s571_s0, 128, %s19_s30, [#allocation3]  }
  0x24   :  { %s427_s18 = scalar_lea.hbm %s573_s2, 2048 }
  0x25   :  { %p428_p2 = scmp.ne.s32.totalorder %s573_s2, %s427_s18  ;;  %p431_p3 = scmp.lt.u32.totalorder %s427_s18, %s573_s2 }
  0x27   :  { %p433_p4 = pnand %p431_p3, %p428_p2 }
  0x29   :  { %436 = shalt.err (!%p433_p4)
}
  0x2a   :  { %s437_s23 = scalar_lea.vmem %s40_s6, 2048  ;;  %p442_p6 = scmp.lt.s32.totalorder %s40_s6, %s40_s6 }
  0x2b   :  { %p438_p5 = scmp.ne.s32.totalorder %s40_s6, %s437_s23  ;;  %p443_p7 = scmp.lt.s32.totalorder %s437_s23, %s437_s23 }
  0x2d   :  { %p444_p8 = por %p443_p7, %p442_p6 }
  0x2f   :  { %p445_p9 = pnand %p444_p8, %p438_p5 }
  0x31   :  { %448 = shalt.err (!%p445_p9)
}
  0x32   :  { %45 = dma.hbm_to_vmem [thread:$0]  %s573_s2, 2048, %s40_s6, [#allocation6], %s478_s25, %s478_s25, %s479_s26  }
  0x33   :  { %471 = dma.done.wait [#allocation3], 128  }
  0x34   :  { %472 = vsyncadd [#allocation3], 4294967168 }
  0x35   :  { %473 = dma.done.wait [#allocation6], 2304  }
  0x36   :  { %474 = vsyncadd [#allocation6], 4294964992  ;;  %v482_v0 = vmov 0.0|0.0   ;;  %vm483_vm0 = vmmov 0   ;;  %v484_v1 = vmov 0.0   ;;  %v58_v2 = vld [vmem:[#allocation5] sm:$0xff]  ;;  %v231_v44 = vlaneseq }
  0x37   :  { %341 = vmatprep.subr.bf16.mxu0 %v482_v0  ;;  %303 = vmatprep.mubr.msk.f32.mxu0 %vm483_vm0, %v484_v1  ;;  %v59_v3 = vld [vmem:[#allocation5 + $0x8] sm:$0xff]  ;;  %v140_v5 = vld [vmem:[#allocation7] sm:$0xff]  ;;  %v141_v6 = vld [vmem:[#allocation7 + $0x8] sm:$0xff]  ;;  %vm65_vm1 = vcmask 130048  }
  0x38   :  { %344 = vmatprep.subr.bf16.mxu1 %v482_v0  ;;  %338 = vmatprep.mubr.msk.f32.mxu1 %vm483_vm0, %v484_v1  ;;  %v342_v4 = vpack.c.bf16 %v59_v3, %v58_v2  ;;  %v142_v7 = vld [vmem:[#allocation7 + $0x10] sm:$0xff]  ;;  %v345_v8 = vpack.c.bf16 %v141_v6, %v140_v5  ;;  %v143_v9 = vld [vmem:[#allocation7 + $0x18] sm:$0xff]  ;;  %v57_v10 = vld [vmem:[#allocation2] sm:$0xff]  ;;  %v232_v46 = vand.u32 127, %v231_v44 }
  0x39   :  { %v348_v11 = vpack.c.bf16 %v143_v9, %v142_v7  ;;  %v144_v12 = vld [vmem:[#allocation7 + $0x20] sm:$0xff]  ;;  %v145_v13 = vld [vmem:[#allocation7 + $0x28] sm:$0xff]  ;;  %v146_v15 = vld [vmem:[#allocation7 + $0x30] sm:$0xff] }
  0x3a   :  { %343 = vmatpush3.bf16.msra.mxu0 %v342_v4  ;;  %346 = vmatpush3.bf16.msra.mxu1 %v345_v8  ;;  %v351_v14 = vpack.c.bf16 %v145_v13, %v144_v12  ;;  %v147_v16 = vld [vmem:[#allocation7 + $0x38] sm:$0xff]  ;;  %v148_v18 = vld [vmem:[#allocation7 + $0x40] sm:$0xff]  ;;  %v149_v19 = vld [vmem:[#allocation7 + $0x48] sm:$0xff]  ;;  %vm233_vm2 = vcmp.ge.s32.totalorder %v232_v46, 8  ;;  %vm234_vm3 = vcmp.lt.s32.totalorder %v232_v46, 16  ;;  %vm254_vm6 = vcmp.lt.s32.totalorder %v232_v46, 8 }
  0x3b   :  { %347 = vmatprep.subr.bf16.mxu1 %v482_v0  ;;  %v354_v17 = vpack.c.bf16 %v147_v16, %v146_v15  ;;  %v357_v20 = vpack.c.bf16 %v149_v19, %v148_v18  ;;  %v150_v21 = vld [vmem:[#allocation7 + $0x50] sm:$0xff]  ;;  %v151_v22 = vld [vmem:[#allocation7 + $0x58] sm:$0xff]  ;;  %v152_v24 = vld [vmem:[#allocation7 + $0x60] sm:$0xff] }
  0x3c   :  { %v360_v23 = vpack.c.bf16 %v151_v22, %v150_v21  ;;  %v153_v25 = vld [vmem:[#allocation7 + $0x68] sm:$0xff]  ;;  %v154_v27 = vld [vmem:[#allocation7 + $0x70] sm:$0xff]  ;;  %v155_v28 = vld [vmem:[#allocation7 + $0x78] sm:$0xff] }
  0x3d   :  { %304 = vmatmul.mubr.msk.f32.vlgmr.msra.gmra.mrb[0].mxu0 %vm65_vm1, %v57_v10  ;;  %v363_v26 = vpack.c.bf16 %v153_v25, %v152_v24  ;;  %v366_v29 = vpack.c.bf16 %v155_v28, %v154_v27  ;;  %v276_v30 = vld [vmem:[%s574_s3] ss:$0 sm:$0xff]  ;;  %v278_v35 = vld [vmem:[%s574_s3 + $0x1] ss:$0 sm:$0xff]  ;;  %vm235_vm5 = vmand %vm233_vm2, %vm234_vm3  ;;  %s485_s3 = smov [#allocation8]  }
  0x3e   :  { %349 = vmatpush3.bf16.msra.mxu1 %v348_v11  ;;  %s266_s28 = sshll.u32 %s485_s3, 4  ;;  %s267_s28 = int_to_ptr.vmem [resolvable:$true] %s266_s28 }
  0x3f   :  { %350 = vmatprep.subr.bf16.mxu1 %v482_v0  ;;  %s449_s29 = scalar_lea.vmem %s267_s28, 128  ;;  %p454_p11 = scmp.lt.s32.totalorder %s267_s28, %s267_s28 }
  0x40   :  { %p450_p10 = scmp.ne.s32.totalorder %s267_s28, %s449_s29  ;;  %p455_p12 = scmp.lt.s32.totalorder %s449_s29, %s449_s29 }
  0x42   :  { %352 = vmatpush3.bf16.msra.mxu1 %v351_v14  ;;  %p456_p13 = por %p455_p12, %p454_p11 }
  0x43   :  { %353 = vmatprep.subr.bf16.mxu1 %v482_v0 }
  0x44   :  { %p457_p0 = pnand %p456_p13, %p450_p10 }
  0x46   :  { %355 = vmatpush3.bf16.msra.mxu1 %v354_v17 }
  0x47   :  { %356 = vmatprep.subr.bf16.mxu1 %v482_v0 }
  0x4a   :  { %358 = vmatpush3.bf16.msra.mxu1 %v357_v20 }
  0x4b   :  { %359 = vmatprep.subr.bf16.mxu1 %v482_v0 }
  0x4e   :  { %361 = vmatpush3.bf16.msra.mxu1 %v360_v23 }
  0x4f   :  { %362 = vmatprep.subr.bf16.mxu1 %v482_v0 }
  0x52   :  { %364 = vmatpush3.bf16.msra.mxu1 %v363_v26 }
  0x53   :  { %365 = vmatprep.subr.bf16.mxu1 %v482_v0 }
  0x56   :  { %367 = vmatpush3.bf16.msra.mxu1 %v366_v29 }
 0x110   :  { %v135_v31 = vpop.f32.mrb[0].mxu0 }
 0x111   :  { %v136_v32 = vadd.f32 %v276_v30, %v135_v31  ;;  %v305_v33 = vpop.f32.mrb[1].mxu0 }
 0x113   :  { %v139_v34 = vmax.f32 %v136_v32, 0.0 }
 0x115   :  { %339 = vmatmul.mubr.f32.vlgmr.msra.gmra.mrb[0].mxu1 %v139_v34 }
 0x1e8   :  { %v227_v36 = vpop.f32.mrb[0].mxu1 }
 0x1e9   :  { %v228_v37 = vadd.f32 %v278_v35, %v227_v36  ;;  %v340_v38 = vpop.f32.mrb[1].mxu1 }
 0x1eb   :  { %v237_v39 = vand.u32 2147483647, %v228_v37  ;;  %v236_v52 = vmax.f32 %v228_v37, 0.0 }
 0x1ed   :  { %v238_v40 = vsub.f32 0.0, %v237_v39 }
 0x1ef   :  { %v239_v41 = vmul.f32 1.442695, %v238_v40 }
 0x1f1   :  { %377 = vpow2.f32 %v239_v41 }
 0x1fb   :  { %v378_v42 = vpop.eup %377 }
 0x1fc   :  { %v241_v43 = vadd.f32 1.0, %v378_v42  ;;  %v244_v45 = vmul.f32 -0.5, %v378_v42  ;;  %v247_v48 = vand.u32 2147483647, %v378_v42 }
 0x1fe   :  { %379 = vlog2.f32 %v241_v43  ;;  %v245_v47 = vadd.f32 1.0, %v244_v45  ;;  %vm248_vm4 = vcmp.lt.f32.partialorder %v247_v48, 0.0004427343 }
 0x1ff   :  { %381 = vtanh.f32 %v228_v37 }
 0x200   :  { %v246_v51 = vmul.f32 %v378_v42, %v245_v47 }
 0x208   :  { %v380_v49 = vpop.eup %379 }
 0x209   :  { %v243_v50 = vmul.f32 0.6931472, %v380_v49  ;;  %v382_v55 = vpop.eup %381 }
 0x20b   :  { %v249_v53 = vsel %vm248_vm4, %v246_v51, %v243_v50 }
 0x20c   :  { %v250_v54 = vadd.f32 %v249_v53, %v236_v52 }
 0x20e   :  { %v253_v56 = vsel %vm235_vm5, %v250_v54, %v228_v37 }
 0x20f   :  { %v258_v57 = vsel %vm254_vm6, %v382_v55, %v253_v56 }
 0x210   :  { %259 = vst [vmem:[#allocation8] sm:$0xff] %v258_v57 }
 0x211   :  { %460 = shalt.err (!%p457_p0)
}
 0x212   :  { %s461_s6 = scalar_lea.hbm %s575_s4, 128 }
 0x213   :  { %p462_p1 = scmp.ne.s32.totalorder %s575_s4, %s461_s6  ;;  %p465_p2 = scmp.lt.u32.totalorder %s461_s6, %s575_s4 }
 0x215   :  { %p467_p3 = pnand %p465_p2, %p462_p1 }
 0x217   :  { %470 = shalt.err (!%p467_p3)
}
 0x218   :  { %269 = dma.vmem_to_hbm [thread:$0]  %s267_s28, 128, %s575_s4, [#allocation4]  }
 0x219   :  { %475 = dma.done.wait [#allocation4], 128  }
 0x21a   :  { %476 = vsyncadd [#allocation4], 4294967168 }
 0x21b   :  { %273 = vsyncpa [#allocation3], 1 }
 0x21c   :  { %274 = vsyncpa [#allocation6], 1 }
 0x21d   :  { %275 = vsyncpa [#allocation4], 1 }

</bundles_post_ra>
